<compile_context>
chip_gen: v6e
topology: v6e:2x2x1
jax: 0.10.0
libtpu: 0.0.40
codegen_flags: <defaults>
</compile_context>

<pallas_src>
import functools

import jax
import jax.numpy as jnp
from jax.experimental import pallas as pl
from jax.experimental.pallas import tpu as pltpu


def _textcnn_kernel(bt, L, f_total,
                    x_ref, w_ref, b_ref, mask_ref, fcw_ref, fcb_ref, o_ref):
    """One batch tile of `bt` samples.

    x_ref   : [bt*L, K_pad]        bf16  (im2col rows, K_pad = pad128(max_fs*dim_h))
    w_ref   : [K_pad, F_total]     bf16  (merged conv weights, tap-major rows)
    b_ref   : [1, F_total]         f32   (merged conv bias)
    mask_ref: [L, F_total]         f32   (1.0 valid temporal position, 0.0 invalid)
    fcw_ref : [F_total, OUT_PAD]   f32   (fc weight, pre-transposed, lane-padded)
    fcb_ref : [1, OUT_PAD]         f32
    o_ref   : [bt, OUT_PAD]        f32
    """
    # Convolution for every filter size in one MXU matmul (zero taps for the
    # shorter filters are zero rows of W, so they contribute nothing).
    acc = jnp.dot(x_ref[...], w_ref[...],
                  preferred_element_type=jnp.float32)        # [bt*L, F_total] f32
    acc = acc + b_ref[...]                                   # conv bias
    acc = jnp.maximum(acc, 0.01 * acc)                       # leaky_relu (slope 0.01)

    # Mask invalid temporal positions per filter-size group, then max-pool over
    # the full valid temporal extent for each sample.
    acc3 = acc.reshape(bt, L, f_total)
    valid = mask_ref[...] > 0.0                              # [L, F_total] bool
    acc3 = jnp.where(valid[None, :, :], acc3, jnp.finfo(jnp.float32).min)
    pooled = jnp.max(acc3, axis=1)                           # [bt, F_total]

    # Dropout: identity in eval mode.
    # TODO(synk): training-mode dropout mask not implemented.

    out = jnp.dot(pooled, fcw_ref[...], preferred_element_type=jnp.float32)
    out = out + fcb_ref[...]
    o_ref[...] = out.astype(o_ref.dtype)


def textcnn_forward(hiddens, conv_ws, conv_bs, fc_w, fc_b,
                    filter_sizes, n_filters, output_dim,
                    compute_dtype=jnp.bfloat16):
    """hiddens: [B, L, dim_h] float32.
    conv_ws[k]: [n_filters, fs_k, dim_h] (Conv2d weight with in_channels squeezed)
    conv_bs[k]: [n_filters]
    fc_w: [output_dim, len(filter_sizes)*n_filters], fc_b: [output_dim]
    Returns [B, output_dim] float32."""
    B, L, dim_h = hiddens.shape
    n_fs = len(filter_sizes)
    max_fs = max(filter_sizes)
    f_total = n_fs * n_filters
    K = max_fs * dim_h
    K_pad = -(-K // 128) * 128                 # lane-dense contraction dim
    out_pad = -(-output_dim // 128) * 128      # lane-dense output store

    # Batch tile: target ~256 MXU rows per step; single grid step for tiny B.
    bt = min(B, max(1, 256 // max(L, 1)))
    if bt < B:
        bt = max(8, (bt // 8) * 8)             # keep sublane-aligned tiles across steps
    b_pad = -(-B // bt) * bt

    # Host-side im2col: x2[b, t, i*dim_h + d] = x[b, t + i, d] (zero past end).
    x = jnp.pad(hiddens.astype(compute_dtype),
                ((0, b_pad - B), (0, max_fs - 1), (0, 0)))   # [b_pad, L+max_fs-1, dim_h]
    taps = [x[:, i:i + L, :] for i in range(max_fs)]
    x2 = jnp.concatenate(taps, axis=-1)                       # [b_pad, L, K]
    x2 = jnp.pad(x2, ((0, 0), (0, 0), (0, K_pad - K)))
    x2 = x2.reshape(b_pad * L, K_pad)                         # [b_pad*L, K_pad] bf16

    # Merged conv weights, tap-major rows to match the im2col lane order:
    # rows [i*dim_h, (i+1)*dim_h) are tap i; group k occupies lanes
    # [k*n_filters, (k+1)*n_filters); taps >= fs_k are zero.
    w = jnp.zeros((max_fs, dim_h, f_total), jnp.float32)
    for k, fs in enumerate(filter_sizes):
        wk = jnp.transpose(jnp.asarray(conv_ws[k], jnp.float32), (1, 2, 0))  # [fs, dim_h, nf]
        w = w.at[:fs, :, k * n_filters:(k + 1) * n_filters].set(wk)
    w = jnp.pad(w.reshape(K, f_total), ((0, K_pad - K), (0, 0))).astype(compute_dtype)

    b = jnp.concatenate([jnp.asarray(cb, jnp.float32) for cb in conv_bs]
                        ).reshape(1, f_total)

    # Validity mask: 1.0 where t < L - fs_k + 1 for group k, else 0.0.
    mask = jnp.ones((L, f_total), jnp.float32)
    for k, fs in enumerate(filter_sizes):
        l_out = L - fs + 1
        if l_out < L:
            mask = mask.at[l_out:, k * n_filters:(k + 1) * n_filters].set(0.0)

    # FC weight/bias, pre-transposed and lane-padded to a multiple of 128.
    fc_wt = jnp.pad(jnp.asarray(fc_w, jnp.float32).T,
                    ((0, 0), (0, out_pad - output_dim)))      # [F_total, out_pad]
    fc_b2 = jnp.pad(jnp.asarray(fc_b, jnp.float32).reshape(1, output_dim),
                    ((0, 0), (0, out_pad - output_dim)))      # [1, out_pad]

    kernel = functools.partial(_textcnn_kernel, bt, L, f_total)
    grid = (b_pad // bt,)

    # Honest FLOP count (only real taps, real output_dim).
    conv_flops = 2 * B * dim_h * n_filters * sum((L - fs + 1) * fs for fs in filter_sizes)
    flops = conv_flops + 2 * B * f_total * output_dim
    bytes_accessed = (x2.size * 2 + w.size * 2
                      + (b.size + mask.size + fc_wt.size + fc_b2.size) * 4
                      + b_pad * out_pad * 4)

    out = pl.pallas_call(
        kernel,
        out_shape=jax.ShapeDtypeStruct((b_pad, out_pad), jnp.float32),
        grid_spec=pltpu.PrefetchScalarGridSpec(
            num_scalar_prefetch=0,
            grid=grid,
            in_specs=[
                pl.BlockSpec((bt * L, K_pad), lambda g: (g, 0)),        # im2col x
                pl.BlockSpec((K_pad, f_total), lambda g: (0, 0)),       # conv W
                pl.BlockSpec((1, f_total), lambda g: (0, 0)),           # conv b
                pl.BlockSpec((L, f_total), lambda g: (0, 0)),           # pool mask
                pl.BlockSpec((f_total, out_pad), lambda g: (0, 0)),     # fc W^T
                pl.BlockSpec((1, out_pad), lambda g: (0, 0)),           # fc b
            ],
            out_specs=pl.BlockSpec((bt, out_pad), lambda g: (g, 0)),
        ),
        compiler_params=pltpu.CompilerParams(
            dimension_semantics=("parallel",),
            # Safe on all generations at these shapes; re-derive (stay well
            # under v7x's 64 MiB physical VMEM) if bt/dim_h/L are scaled up.
            vmem_limit_bytes=32 * 1024 * 1024),
        cost_estimate=pl.CostEstimate(
            flops=int(flops), transcendentals=0, bytes_accessed=int(bytes_accessed)),
    )(x2, w, b, mask, fc_wt, fc_b2)
    return out[:B, :output_dim]


def reference_forward(hiddens, conv_ws, conv_bs, fc_w, fc_b,
                      filter_sizes, n_filters, compute_dtype=jnp.bfloat16):
    """Pure-JAX reference mirroring the PyTorch module (eval mode), using the
    same bf16 rounding of activations/conv weights as the kernel."""
    B, L, dim_h = hiddens.shape
    x = hiddens.astype(compute_dtype).astype(jnp.float32)
    hp = jax.lax.Precision.HIGHEST
    pooled = []
    for k, fs in enumerate(filter_sizes):
        W = jnp.asarray(conv_ws[k], jnp.float32).astype(compute_dtype).astype(jnp.float32)
        l_out = L - fs + 1
        acc = jnp.zeros((B, l_out, n_filters), jnp.float32)
        for i in range(fs):
            acc = acc + jnp.einsum('bld,fd->blf', x[:, i:i + l_out, :], W[:, i, :],
                                   precision=hp)
        acc = acc + conv_bs[k][None, None, :]
        acc = jnp.where(acc > 0, acc, 0.01 * acc)
        pooled.append(jnp.max(acc, axis=1))       # [B, n_filters]
    cat = jnp.concatenate(pooled, axis=1)
    return jnp.dot(cat, fc_w.T, precision=hp) + fc_b


if __name__ == "__main__":
    # Small shapes consistent with the module.
    B, L = 4, 16
    dim_h = 32
    n_filters = 8
    filter_sizes = [3, 4, 5]
    output_dim = 4

    key = jax.random.PRNGKey(0)
    keys = jax.random.split(key, 2 * len(filter_sizes) + 3)

    hiddens = jax.random.normal(keys[0], (B, L, dim_h), dtype=jnp.float32)

    conv_ws, conv_bs = [], []
    for k, fs in enumerate(filter_sizes):
        # PyTorch Conv2d weight shape is [n_filters, 1, fs, dim_h]; squeeze in_channels=1.
        conv_ws.append(0.1 * jax.random.normal(keys[1 + 2 * k],
                                               (n_filters, fs, dim_h), jnp.float32))
        conv_bs.append(0.1 * jax.random.normal(keys[2 + 2 * k],
                                               (n_filters,), jnp.float32))
    fc_w = 0.1 * jax.random.normal(keys[-2],
                                   (output_dim, len(filter_sizes) * n_filters),
                                   jnp.float32)
    fc_b = 0.1 * jax.random.normal(keys[-1], (output_dim,), jnp.float32)

    out = textcnn_forward(hiddens, conv_ws, conv_bs, fc_w, fc_b,
                          filter_sizes, n_filters, output_dim)
    out = jax.block_until_ready(out)

    ref = reference_forward(hiddens, conv_ws, conv_bs, fc_w, fc_b,
                            filter_sizes, n_filters)
    assert out.shape == (B, output_dim)
    assert jnp.allclose(out, ref, atol=5e-3, rtol=5e-3), (out, ref)

    print("KERNEL_OK")
</pallas_src>

<mosaic_0001>
module attributes {stable_mosaic.version = 11 : i64} {
  func.func @_textcnn_kernel(%arg0: i32, %arg1: memref<64x256xbf16, #tpu.memory_space<vmem>>, %arg2: memref<256x24xbf16, #tpu.memory_space<vmem>>, %arg3: memref<1x24xf32, #tpu.memory_space<vmem>>, %arg4: memref<16x24xf32, #tpu.memory_space<vmem>>, %arg5: memref<24x128xf32, #tpu.memory_space<vmem>>, %arg6: memref<1x128xf32, #tpu.memory_space<vmem>>, %arg7: memref<4x128xf32, #tpu.memory_space<vmem>>) attributes {dimension_semantics = [#tpu.dimension_semantics<parallel>], iteration_bounds = array<i64: 1>, scalar_prefetch = 0 : i64, scratch_operands = 0 : i64, tpu.core_type = #tpu.core_type<tc>, window_params = [{transform_indices = @transform_0, window_bounds = array<i64: 64, 256>}, {pipeline_mode = #tpu.pipeline_mode<synchronous>, transform_indices = @transform_1, window_bounds = array<i64: 256, 24>}, {pipeline_mode = #tpu.pipeline_mode<synchronous>, transform_indices = @transform_2, window_bounds = array<i64: 1, 24>}, {pipeline_mode = #tpu.pipeline_mode<synchronous>, transform_indices = @transform_3, window_bounds = array<i64: 16, 24>}, {pipeline_mode = #tpu.pipeline_mode<synchronous>, transform_indices = @transform_4, window_bounds = array<i64: 24, 128>}, {pipeline_mode = #tpu.pipeline_mode<synchronous>, transform_indices = @transform_5, window_bounds = array<i64: 1, 128>}, {transform_indices = @transform_6, window_bounds = array<i64: 4, 128>}]} {
    %c0 = arith.constant 0 : index
    %c0_0 = arith.constant 0 : index
    %0 = vector.load %arg1[%c0, %c0_0] : memref<64x256xbf16, #tpu.memory_space<vmem>>, vector<64x256xbf16>
    %c0_1 = arith.constant 0 : index
    %c0_2 = arith.constant 0 : index
    %1 = vector.load %arg2[%c0_1, %c0_2] : memref<256x24xbf16, #tpu.memory_space<vmem>>, vector<256x24xbf16>
    %cst = arith.constant dense<0.000000e+00> : vector<64x24xf32>
    %2 = tpu.matmul %0, %1, %cst {dimension_numbers = #tpu.dot_dimension_numbers<[1], [0], [0], [1], [0, 0, 1, 1], [], []>} : vector<64x256xbf16>, vector<256x24xbf16>, vector<64x24xf32> -> vector<64x24xf32>
    %c0_3 = arith.constant 0 : index
    %c0_4 = arith.constant 0 : index
    %3 = vector.load %arg3[%c0_3, %c0_4] : memref<1x24xf32, #tpu.memory_space<vmem>>, vector<1x24xf32>
    %4 = vector.broadcast %3 : vector<1x24xf32> to vector<64x24xf32>
    %5 = arith.addf %2, %4 : vector<64x24xf32>
    %cst_5 = arith.constant 0.00999999977 : f32
    %6 = vector.broadcast %cst_5 : f32 to vector<64x24xf32>
    %7 = arith.mulf %6, %5 : vector<64x24xf32>
    %8 = arith.maximumf %5, %7 : vector<64x24xf32>
    %9 = vector.shape_cast %8 : vector<64x24xf32> to vector<4x16x24xf32>
    %c0_6 = arith.constant 0 : index
    %c0_7 = arith.constant 0 : index
    %10 = vector.load %arg4[%c0_6, %c0_7] : memref<16x24xf32, #tpu.memory_space<vmem>>, vector<16x24xf32>
    %cst_8 = arith.constant 0.000000e+00 : f32
    %11 = vector.broadcast %cst_8 : f32 to vector<16x24xf32>
    %12 = arith.cmpf ogt, %10, %11 : vector<16x24xf32>
    %13 = vector.shape_cast %12 : vector<16x24xi1> to vector<1x16x24xi1>
    %cst_9 = arith.constant -3.40282347E+38 : f32
    %14 = vector.shape_cast %13 : vector<1x16x24xi1> to vector<1x16x24xi1>
    %15 = vector.broadcast %14 : vector<1x16x24xi1> to vector<4x16x24xi1>
    %16 = vector.broadcast %cst_9 : f32 to vector<4x16x24xf32>
    %17 = arith.select %15, %9, %16 : vector<4x16x24xi1>, vector<4x16x24xf32>
    %cst_10 = arith.constant dense<0xFF800000> : vector<4x24xf32>
    %18 = vector.multi_reduction <maximumf>, %17, %cst_10 [1] : vector<4x16x24xf32> to vector<4x24xf32>
    %c0_11 = arith.constant 0 : index
    %c0_12 = arith.constant 0 : index
    %19 = vector.load %arg5[%c0_11, %c0_12] : memref<24x128xf32, #tpu.memory_space<vmem>>, vector<24x128xf32>
    %cst_13 = arith.constant dense<0.000000e+00> : vector<4x128xf32>
    %20 = tpu.matmul %18, %19, %cst_13 {dimension_numbers = #tpu.dot_dimension_numbers<[1], [0], [0], [1], [0, 0, 1, 1], [], []>} : vector<4x24xf32>, vector<24x128xf32>, vector<4x128xf32> -> vector<4x128xf32>
    %c0_14 = arith.constant 0 : index
    %c0_15 = arith.constant 0 : index
    %21 = vector.load %arg6[%c0_14, %c0_15] : memref<1x128xf32, #tpu.memory_space<vmem>>, vector<1x128xf32>
    %22 = vector.broadcast %21 : vector<1x128xf32> to vector<4x128xf32>
    %23 = arith.addf %20, %22 : vector<4x128xf32>
    %c0_16 = arith.constant 0 : index
    %c0_17 = arith.constant 0 : index
    %24 = vector.load %arg7[%c0_16, %c0_17] : memref<4x128xf32, #tpu.memory_space<vmem>>, vector<4x128xf32>
    tpu.vector_store %arg7[%c0_16, %c0_17], %23 {strides = array<i32>} : memref<4x128xf32, #tpu.memory_space<vmem>>, vector<4x128xf32>,
    return
  }
  func.func @transform_0(%arg0: i32) -> (i32, i32) {
    %c0_i32 = arith.constant 0 : i32
    %c0_i32_0 = arith.constant 0 : i32
    return %arg0, %c0_i32 : i32, i32
  }
  func.func @transform_1(%arg0: i32) -> (i32, i32) {
    %c0_i32 = arith.constant 0 : i32
    %c0_i32_0 = arith.constant 0 : i32
    %c0_i32_1 = arith.constant 0 : i32
    return %c0_i32, %c0_i32_0 : i32, i32
  }
  func.func @transform_2(%arg0: i32) -> (i32, i32) {
    %c0_i32 = arith.constant 0 : i32
    %c0_i32_0 = arith.constant 0 : i32
    %c0_i32_1 = arith.constant 0 : i32
    return %c0_i32, %c0_i32_0 : i32, i32
  }
  func.func @transform_3(%arg0: i32) -> (i32, i32) {
    %c0_i32 = arith.constant 0 : i32
    %c0_i32_0 = arith.constant 0 : i32
    %c0_i32_1 = arith.constant 0 : i32
    return %c0_i32, %c0_i32_0 : i32, i32
  }
  func.func @transform_4(%arg0: i32) -> (i32, i32) {
    %c0_i32 = arith.constant 0 : i32
    %c0_i32_0 = arith.constant 0 : i32
    %c0_i32_1 = arith.constant 0 : i32
    return %c0_i32, %c0_i32_0 : i32, i32
  }
  func.func @transform_5(%arg0: i32) -> (i32, i32) {
    %c0_i32 = arith.constant 0 : i32
    %c0_i32_0 = arith.constant 0 : i32
    %c0_i32_1 = arith.constant 0 : i32
    return %c0_i32, %c0_i32_0 : i32, i32
  }
  func.func @transform_6(%arg0: i32) -> (i32, i32) {
    %c0_i32 = arith.constant 0 : i32
    %c0_i32_0 = arith.constant 0 : i32
    return %arg0, %c0_i32 : i32, i32
  }
}

</mosaic_0001>

<bundles_post_ra>
// kernel: tpu_custom_call.1
= control target key start
LH: loop header
LB: loop body
LE: loop exit
PB: predicated region body
PF: predicated region fallthrough
CT: control target
= control target key end

     0   :  { %s759_s0 = inlined_call_operand.vmem [shape: bf16[64,256], index: 0, kind: input, shape index: {}]   ;;  %s760_s1 = inlined_call_operand.vmem [shape: bf16[256,24], index: 1, kind: input, shape index: {}]   ;;  %s761_s2 = inlined_call_operand.vmem [shape: f32[1,24], index: 2, kind: input, shape index: {}]   ;;  %s762_s3 = inlined_call_operand.vmem [shape: f32[16,24], index: 3, kind: input, shape index: {}]   ;;  %s763_s4 = inlined_call_operand.vmem [shape: f32[24,128], index: 4, kind: input, shape index: {}]   ;;  %s764_s5 = inlined_call_operand.vmem [shape: f32[1,128], index: 5, kind: input, shape index: {}]   ;;  %s765_s6 = inlined_call_operand.hbm [shape: f32[4,128], index: 6, kind: output, shape index: {}]  }
   0x1   :  { %v548_v0 = vld [vmem:[%s760_s1 + $0x78] sm:$0xff]   ;;  %v550_v2 = vld [vmem:[%s760_s1 + $0x70] sm:$0xff]   ;;  %v552_v4 = vld [vmem:[%s760_s1 + $0x68] sm:$0xff]  }
   0x2   :  { %v549_v1 = vld [vmem:[%s760_s1 + $0x38] sm:$0xff]   ;;  %476 = vmatprep.subr.bf16.mxu0 %v548_v0  ;;  %529 = vmatprep.subr.bf16.mxu1 %v548_v0  ;;  %v551_v3 = vld [vmem:[%s760_s1 + $0x30] sm:$0xff]   ;;  %v553_v5 = vld [vmem:[%s760_s1 + $0x28] sm:$0xff]  }
   0x3   :  { %477 = vmatpush3.bf16.msra.mxu0 %v549_v1  ;;  %537 = vmatpush3.bf16.msra.mxu1 %v549_v1  ;;  %v554_v6 = vld [vmem:[%s760_s1 + $0x60] sm:$0xff]   ;;  %v556_v8 = vld [vmem:[%s760_s1 + $0x58] sm:$0xff]   ;;  %v558_v10 = vld [vmem:[%s760_s1 + $0x50] sm:$0xff]  }
   0x4   :  { %478 = vmatprep.subr.bf16.mxu0 %v550_v2  ;;  %530 = vmatprep.subr.bf16.mxu1 %v550_v2  ;;  %v555_v7 = vld [vmem:[%s760_s1 + $0x20] sm:$0xff]   ;;  %v557_v9 = vld [vmem:[%s760_s1 + $0x18] sm:$0xff]   ;;  %v559_v13 = vld [vmem:[%s760_s1 + $0x10] sm:$0xff]  }
   0x5   :  { %v566_v11 = vld [vmem:[%s759_s0 + $0x4] ss:$8 sps:$4 sm:$0xff]   ;;  %v569_v12 = vld [vmem:[%s759_s0 + $0x34] ss:$8 sps:$4 sm:$0xff]  }
   0x6   :  { %v560_v14 = vld [vmem:[%s760_s1 + $0x48] sm:$0xff]   ;;  %240 = vmatprep.mubr.bf16.mxu0 %v566_v11  ;;  %264 = vmatprep.mubr.bf16.mxu1 %v569_v12 }
   0x7   :  { %479 = vmatpush3.bf16.msra.mxu0 %v551_v3  ;;  %538 = vmatpush3.bf16.msra.mxu1 %v551_v3 }
   0x8   :  { %480 = vmatprep.subr.bf16.mxu0 %v552_v4  ;;  %531 = vmatprep.subr.bf16.mxu1 %v552_v4 }
   0xb   :  { %481 = vmatpush3.bf16.msra.mxu0 %v553_v5  ;;  %539 = vmatpush3.bf16.msra.mxu1 %v553_v5 }
   0xc   :  { %482 = vmatprep.subr.bf16.mxu0 %v554_v6  ;;  %532 = vmatprep.subr.bf16.mxu1 %v554_v6 }
   0xf   :  { %483 = vmatpush3.bf16.msra.mxu0 %v555_v7  ;;  %540 = vmatpush3.bf16.msra.mxu1 %v555_v7 }
  0x10   :  { %484 = vmatprep.subr.bf16.mxu0 %v556_v8  ;;  %533 = vmatprep.subr.bf16.mxu1 %v556_v8 }
  0x13   :  { %485 = vmatpush3.bf16.msra.mxu0 %v557_v9  ;;  %541 = vmatpush3.bf16.msra.mxu1 %v557_v9 }
  0x14   :  { %486 = vmatprep.subr.bf16.mxu0 %v558_v10  ;;  %534 = vmatprep.subr.bf16.mxu1 %v558_v10 }
  0x15   :  { %11 = vsyncpa [#allocation3], 0  ;;  %v561_v15 = vld [vmem:[%s760_s1 + $0x8] sm:$0xff]   ;;  %v562_v16 = vld [vmem:[%s760_s1 + $0x40] sm:$0xff]   ;;  %v598_v25 = vmov 0.0   ;;  %vm599_vm0 = vmmov 0  }
  0x16   :  { %v563_v17 = vld [vmem:[%s760_s1] sm:$0xff]   ;;  %v567_v19 = vld [vmem:[%s759_s0 + $0x30] ss:$8 sps:$4 sm:$0xff]   ;;  %v570_v20 = vld [vmem:[%s759_s0 + $0x14] ss:$8 sps:$4 sm:$0xff]   ;;  %vm305_vm3 = vcmask 195584  }
  0x17   :  { %487 = vmatpush3.bf16.msra.mxu0 %v559_v13  ;;  %542 = vmatpush3.bf16.msra.mxu1 %v559_v13  ;;  %v564_v18 = vld [vmem:[%s759_s0] ss:$8 sps:$4 sm:$0xff]   ;;  %v572_v21 = vld [vmem:[%s759_s0 + $0x10] ss:$8 sps:$4 sm:$0xff]   ;;  %v573_v22 = vld [vmem:[%s759_s0 + $0x24] ss:$8 sps:$4 sm:$0xff]  }
  0x18   :  { %488 = vmatprep.subr.bf16.mxu0 %v560_v14  ;;  %535 = vmatprep.subr.bf16.mxu1 %v560_v14  ;;  %v575_v23 = vld [vmem:[%s759_s0 + $0x20] ss:$8 sps:$4 sm:$0xff]   ;;  %v344_v24 = vld [vmem:[%s763_s4 + $0x10] sm:$0xff]  ;;  %vm356_vm4 = vcmask 1041409   ;;  %vm358_vm5 = vcmask 1042434   ;;  %vm360_vm6 = vcmask 1043459  }
  0x19   :  { %v343_v26 = vld [vmem:[%s763_s4 + $0x8] sm:$0xff]  ;;  %v342_v27 = vld [vmem:[%s763_s4] sm:$0xff]  ;;  %s600_s30 = smov [#allocation2]  }
  0x1a   :  { %v720_v30 = vld [vmem:[%s761_s2] ss:$0 sm:$0xff]  ;;  %v290_v48 = vld [vmem:[%s762_s3 + $0x8] sm:$0xff]  ;;  %s441_s7 = sshll.u32 %s600_s30, 4  ;;  %s442_s7 = int_to_ptr.vmem [resolvable:$true] %s441_s7 }
  0x1b   :  { %489 = vmatpush3.bf16.msra.mxu0 %v561_v15  ;;  %543 = vmatpush3.bf16.msra.mxu1 %v561_v15  ;;  %v289_v46 = vld [vmem:[%s762_s3] sm:$0xff]  ;;  %vm292_vm2 = vcmp.gt.f32.partialorder %v290_v48, 0.0  ;;  %s576_s8 = scalar_lea.vmem %s442_s7, 64  ;;  %p581_p1 = scmp.lt.s32.totalorder %s442_s7, %s442_s7 }
  0x1c   :  { %490 = vmatprep.subr.bf16.mxu0 %v562_v16  ;;  %536 = vmatprep.subr.bf16.mxu1 %v562_v16  ;;  %vm291_vm1 = vcmp.gt.f32.partialorder %v289_v46, 0.0  ;;  %p577_p0 = scmp.ne.s32.totalorder %s442_s7, %s576_s8  ;;  %p582_p2 = scmp.lt.s32.totalorder %s576_s8, %s576_s8 }
  0x1e   :  { %p583_p3 = por %p582_p2, %p581_p1 }
  0x1f   :  { %491 = vmatpush3.bf16.msra.mxu0 %v563_v17  ;;  %544 = vmatpush3.bf16.msra.mxu1 %v563_v17 }
  0x20   :  { %520 = vmatprep.subr.mxu1 %v598_v25  ;;  %p584_p4 = pnand %p583_p3, %p577_p0 }
  0x22   :  { %241 = vmatmul.mubr.bf16.vlgmr.msra.gmra.mxu0 %v564_v18  ;;  %265 = vmatmul.mubr.bf16.vlgmr.msra.gmra.mxu1 %v567_v19 }
  0x23   :  { %248 = vmatprep.mubr.bf16.mxu0 %v570_v20  ;;  %526 = vmatprep.mubr.msk.f32.mxu1 %vm599_vm0, %v598_v25 }
  0x24   :  { %521 = vmatpush3.msra.mxu1 %v344_v24 }
  0x25   :  { %522 = vmatprep.subr.mxu1 %v598_v25 }
  0x26   :  { %523 = vmatpush3.msra.mxu1 %v343_v26 }
  0x27   :  { %524 = vmatprep.subr.mxu1 %v598_v25 }
  0x28   :  { %525 = vmatpush3.msra.mxu1 %v342_v27 }
  0x2a   :  { %249 = vmatmul.mubr.bf16.gmra.mxu0 %v572_v21 }
  0x2b   :  { %256 = vmatprep.mubr.bf16.mxu0 %v573_v22 }
  0x32   :  { %257 = vmatmul.mubr.bf16.gmra.mxu0 %v575_v23 }
  0xe2   :  { %v492_v28 = vpop.f32.mrf.mxu0  ;;  %v510_v29 = vpop.f32.mrf.mxu1 }
  0xe4   :  { %v493_v31 = vpop.f32.mrf.mxu0  ;;  %v511_v32 = vpop.f32.mrf.mxu1 }
  0xe5   :  { %v494_v33 = vadd.f32 %v493_v31, %v492_v28  ;;  %v512_v34 = vadd.f32 %v511_v32, %v510_v29 }
  0xe6   :  { %v495_v35 = vpop.f32.mrf.mxu0  ;;  %v513_v36 = vpop.f32.mrf.mxu1 }
  0xe7   :  { %v243_v37 = vadd.f32 %v494_v33, %v720_v30  ;;  %v267_v38 = vadd.f32 %v512_v34, %v720_v30 }
  0xe8   :  { %v496_v39 = vpop.f32.mrf.mxu0  ;;  %v514_v40 = vpop.f32.mrf.mxu1 }
  0xe9   :  { %v273_v41 = vmul.f32 0.01, %v243_v37  ;;  %v497_v42 = vadd.f32 %v496_v39, %v495_v35  ;;  %v515_v43 = vadd.f32 %v514_v40, %v513_v36  ;;  %v279_v44 = vmul.f32 0.01, %v267_v38 }
  0xea   :  { %v498_v45 = vpop.f32.mrf.mxu0 }
  0xeb   :  { %v246_v47 = vadd.f32 %v497_v42, %v720_v30  ;;  %v270_v49 = vadd.f32 %v515_v43, %v720_v30  ;;  %v281_v51 = vmax.f32 %v243_v37, %v273_v41  ;;  %v287_v54 = vmax.f32 %v267_v38, %v279_v44 }
  0xec   :  { %v499_v50 = vpop.f32.mrf.mxu0 }
  0xed   :  { %v274_v52 = vmul.f32 0.01, %v246_v47  ;;  %v500_v53 = vadd.f32 %v499_v50, %v498_v45  ;;  %v280_v55 = vmul.f32 0.01, %v270_v49  ;;  %v297_v61 = vsel %vm291_vm1, %v281_v51, -3.4028235e+38 }
  0xee   :  { %v501_v56 = vpop.f32.mrf.mxu0  ;;  %v303_v1 = vsel %vm291_vm1, %v287_v54, -3.4028235e+38  ;;  %v306_v7 = vsel %vm305_vm3, %v297_v61, -inf }
  0xef   :  { %v282_v57 = vmax.f32 %v246_v47, %v274_v52  ;;  %v251_v58 = vadd.f32 %v500_v53, %v720_v30  ;;  %v288_v59 = vmax.f32 %v270_v49, %v280_v55  ;;  %v333_v9 = vsel %vm305_vm3, %v303_v1, -inf }
  0xf0   :  { %v502_v60 = vpop.f32.mrf.mxu0 }
  0xf1   :  { %v298_v62 = vsel %vm292_vm2, %v282_v57, -3.4028235e+38  ;;  %v275_v63 = vmul.f32 0.01, %v251_v58  ;;  %v503_v0 = vadd.f32 %v502_v60, %v501_v56  ;;  %v304_v2 = vsel %vm292_vm2, %v288_v59, -3.4028235e+38 }
  0xf2   :  { %v504_v3 = vpop.f32.mrf.mxu0  ;;  %v307_v4 = vsel %vm305_vm3, %v298_v62, -inf  ;;  %v334_v10 = vsel %vm305_vm3, %v304_v2, -inf  ;;  %v474_v62 = vld [vmem:[%s764_s5] ss:$0 sm:$0xff] }
  0xf3   :  { %v283_v5 = vmax.f32 %v251_v58, %v275_v63  ;;  %v254_v6 = vadd.f32 %v503_v0, %v720_v30  ;;  %v308_v13 = vmax.f32 %v306_v7, %v307_v4  ;;  %v335_v18 = vmax.f32 %v333_v9, %v334_v10 }
  0xf4   :  { %v505_v8 = vpop.f32.mrf.mxu0 }
  0xf5   :  { %v276_v11 = vmul.f32 0.01, %v254_v6  ;;  %v506_v12 = vadd.f32 %v505_v8, %v504_v3  ;;  %v299_v15 = vsel %vm291_vm1, %v283_v5, -3.4028235e+38  ;;  %v309_v23 = vrot.slane %v308_v13, 4 }
  0xf6   :  { %v507_v14 = vpop.f32.mrf.mxu0  ;;  %v315_v24 = vsel %vm305_vm3, %v299_v15, -inf  ;;  %v336_v29 = vrot.slane %v335_v18, 4 }
  0xf7   :  { %v284_v16 = vmax.f32 %v254_v6, %v276_v11  ;;  %v259_v17 = vadd.f32 %v506_v12, %v720_v30  ;;  %v310_v33 = vmax.f32 %v308_v13, %v309_v23 }
  0xf8   :  { %v508_v19 = vpop.f32.mrf.mxu0  ;;  %v337_v37 = vmax.f32 %v335_v18, %v336_v29 }
  0xf9   :  { %v300_v20 = vsel %vm292_vm2, %v284_v16, -3.4028235e+38  ;;  %v277_v21 = vmul.f32 0.01, %v259_v17  ;;  %v509_v22 = vadd.f32 %v508_v19, %v507_v14  ;;  %v311_v40 = vrot.slane %v310_v33, 2 }
  0xfa   :  { %v316_v25 = vsel %vm305_vm3, %v300_v20, -inf  ;;  %v338_v44 = vrot.slane %v337_v37, 2 }
  0xfb   :  { %v317_v26 = vmax.f32 %v315_v24, %v316_v25  ;;  %v285_v27 = vmax.f32 %v259_v17, %v277_v21  ;;  %v262_v28 = vadd.f32 %v509_v22, %v720_v30  ;;  %v312_v47 = vmax.f32 %v310_v33, %v311_v40 }
  0xfc   :  { %v339_v51 = vmax.f32 %v337_v37, %v338_v44 }
  0xfd   :  { %v318_v31 = vrot.slane %v317_v26, 4  ;;  %v278_v32 = vmul.f32 0.01, %v262_v28  ;;  %v301_v35 = vsel %vm291_vm1, %v285_v27, -3.4028235e+38  ;;  %v313_v52 = vrot.slane %v312_v47, 1 }
  0xfe   :  { %v324_v41 = vsel %vm305_vm3, %v301_v35, -inf  ;;  %v340_v55 = vrot.slane %v339_v51, 1 }
  0xff   :  { %v319_v34 = vmax.f32 %v317_v26, %v318_v31  ;;  %v286_v36 = vmax.f32 %v262_v28, %v278_v32  ;;  %v314_v56 = vmax.f32 %v312_v47, %v313_v52 }
 0x100   :  { %v341_v58 = vmax.f32 %v339_v51, %v340_v55 }
 0x101   :  { %v320_v38 = vrot.slane %v319_v34, 2  ;;  %v302_v39 = vsel %vm292_vm2, %v286_v36, -3.4028235e+38 }
 0x102   :  { %v325_v42 = vsel %vm305_vm3, %v302_v39, -inf }
 0x103   :  { %v326_v43 = vmax.f32 %v324_v41, %v325_v42  ;;  %v321_v30 = vmax.f32 %v319_v34, %v320_v38 }
 0x105   :  { %v327_v45 = vrot.slane %v326_v43, 4  ;;  %v322_v50 = vrot.slane %v321_v30, 1 }
 0x107   :  { %v328_v49 = vmax.f32 %v326_v43, %v327_v45  ;;  %v323_v54 = vmax.f32 %v321_v30, %v322_v50 }
 0x109   :  { %v329_v46 = vrot.slane %v328_v49, 2  ;;  %v357_v59 = vsel %vm356_vm4, %v323_v54, %v314_v56 }
 0x10b   :  { %v330_v53 = vmax.f32 %v328_v49, %v329_v46 }
 0x10d   :  { %v331_v48 = vrot.slane %v330_v53, 1 }
 0x10f   :  { %v332_v57 = vmax.f32 %v330_v53, %v331_v48 }
 0x111   :  { %v359_v60 = vsel %vm358_vm5, %v332_v57, %v357_v59 }
 0x112   :  { %v361_v61 = vsel %vm360_vm6, %v341_v58, %v359_v60 }
 0x113   :  { %527 = vmatmul.mubr.msk.f32.vlgmr.msra.gmra.mxu1 %vm305_vm3, %v361_v61 }
 0x1d3   :  { %v430_v63 = vpop.f32.mrf.mxu1 }
 0x1d4   :  { %v431_v0 = vadd.f32 %v474_v62, %v430_v63 }
 0x1d5   :  { %v528_v1 = vpop.f32.mrf.mxu1 }
 0x1d6   :  { %434 = vst [vmem:[#allocation2] sm:$0xf] %v431_v0 }
 0x1d7   :  { %587 = shalt.err (!%p584_p4)
}
 0x1d8   :  { %444 = dma.vmem_to_hbm [thread:$0]  %s442_s7, 64, %s765_s6, [#allocation3]  }
 0x1d9   :  { %596 = dma.done.wait [#allocation3], 64  }
 0x1da   :  { %597 = vsyncadd [#allocation3], 4294967232 }
 0x1db   :  { %448 = vsyncpa [#allocation3], 1 }

</bundles_post_ra>
